<compile_context>
chip_gen: v5e
topology: v5e:2x2
jax: 0.10.0
libtpu: 0.0.40
codegen_flags: <defaults>
</compile_context>

<pallas_src>
import functools

import jax
import jax.numpy as jnp
from jax.experimental import pallas as pl
from jax.experimental.pallas import tpu as pltpu


def _gru_stacked_kernel(state_ref, params_ref, labels_ref, ret_ref, loss_ref):
    Cp1, B, H = state_ref.shape
    C = Cp1 - 1
    I = H                                  # packing requires I == H (asserted in wrapper)
    T = ret_ref.shape[1] // H
    G = 3 * H

    USE_FMA = max(I, H) <= 8               # tiny K -> VPU FMA, else MXU matmul

    # ---- Hoist parameters and all loop-invariant broadcasts out of the loop ----
    wih_rows, whh_rows = [], []            # pre-broadcast (B, 3H) rows for VPU path
    wihs, whhs = [], []                    # (K, 3H) matrices for the MXU fallback
    b_rz_list, b_ihn_list, b_hhn_list = [], [], []
    for c in range(C):
        p = params_ref[c]                              # (I+H+2, 3H), one small load
        b_ih = p[I + H:I + H + 1, :]                   # (1, 3H)
        b_hh = p[I + H + 1:I + H + 2, :]               # (1, 3H)
        # r/z: sigmoid(gi+gh) -> fold b_ih+b_hh once; keep b_hh_n separate.
        b_rz_list.append(jnp.broadcast_to(b_ih[:, :2 * H] + b_hh[:, :2 * H], (B, 2 * H)))
        b_ihn_list.append(jnp.broadcast_to(b_ih[:, 2 * H:], (B, H)))
        b_hhn_list.append(jnp.broadcast_to(b_hh[:, 2 * H:], (B, H)))
        if USE_FMA:
            wih_rows.append([jnp.broadcast_to(p[k:k + 1, :], (B, G)) for k in range(I)])
            whh_rows.append([jnp.broadcast_to(p[I + k:I + k + 1, :], (B, G)) for k in range(H)])
        else:
            wihs.append(p[:I, :])
            whhs.append(p[I:I + H, :])

    def fused_matmul(a, c, rows, mats):
        # a: (B, K) recurrent activation; weights are hoisted/pre-broadcast above.
        if USE_FMA:
            acc = a[:, 0:1] * rows[c][0]
            for k in range(1, len(rows[c])):
                acc = acc + a[:, k:k + 1] * rows[c][k]
            return acc
        return jnp.dot(a, mats[c], preferred_element_type=jnp.float32)

    out = state_ref[0]                     # (B, I)
    hs = [state_ref[1 + c] for c in range(C)]
    outs = []

    # TODO(synk): for large unroll_for switch this static unroll to
    # lax.fori_loop (carrying hs/out) to bound vreg live ranges.
    for _ in range(T):                     # static unroll (unroll_for = 2)
        for c in range(C):                 # static unroll over stacked cells
            h = hs[c]
            gi = fused_matmul(out, c, wih_rows, wihs)      # (B, 3H)  [r | z | n]
            gh = fused_matmul(h, c, whh_rows, whhs)        # (B, 3H)
            rz = jax.nn.sigmoid(gi[:, :2 * H] + gh[:, :2 * H] + b_rz_list[c])
            r = rz[:, :H]
            z = rz[:, H:]
            n = jnp.tanh(gi[:, 2 * H:] + b_ihn_list[c] + r * (gh[:, 2 * H:] + b_hhn_list[c]))
            h_new = (1.0 - z) * n + z * h
            hs[c] = h_new
            out = h_new
        outs.append(out)

    # One lane-dense store of the full (B, T*H) slab, then one-shot MSE.
    stacked = jnp.concatenate(outs, axis=1) if T > 1 else outs[0]   # (B, T*H)
    ret_ref[...] = stacked
    diff = stacked - labels_ref[...]
    loss_ref[0] = jnp.sum(diff * diff) / jnp.float32(T * B * H)


@functools.partial(jax.jit, static_argnames=("unroll_for",))
def gru_cell_stacked(x, h0, w_ih, w_hh, b_ih, b_hh, labels, *, unroll_for):
    """x:(B,I), h0:(C,B,H), w_ih:(C,I,3H), w_hh:(C,H,3H), b_*:(C,1,3H), labels:(B,T,H)."""
    B, I = x.shape
    C, _, H = h0.shape
    T = unroll_for
    assert I == H, "state-slab packing and cell chaining require input_size == hidden_size"

    # Consolidate 7 tiny inputs into 3 VMEM slabs (fewer DMA descriptors).
    state = jnp.concatenate([x[None], h0], axis=0)                 # (1+C, B, H)
    params = jnp.concatenate([w_ih, w_hh, b_ih, b_hh], axis=1)     # (C, I+H+2, 3H)
    labels_flat = labels.reshape(B, T * H)                         # lane-dense

    vmem = pl.BlockSpec(memory_space=pltpu.MemorySpace.VMEM)
    smem = pl.BlockSpec(memory_space=pltpu.MemorySpace.SMEM)

    ret_flat, loss = pl.pallas_call(
        _gru_stacked_kernel,
        out_shape=(
            jax.ShapeDtypeStruct((B, T * H), jnp.float32),
            jax.ShapeDtypeStruct((1,), jnp.float32),
        ),
        in_specs=[vmem, vmem, vmem],
        out_specs=(vmem, smem),
    )(state, params, labels_flat)

    return ret_flat.reshape(B, T, H), loss[0]


def init_gru_params(key, num_grucell, input_size, hidden_size):
    """Deterministic init mimicking torch.nn.GRUCell: U(-1/sqrt(H), 1/sqrt(H)).

    Packs weights so the gate axis is the lane axis:
      weight_ih (3H, I) -> (I, 3H) with column blocks [r | z | n]
      weight_hh (3H, H) -> (H, 3H)
      biases    (3H,)   -> (1, 3H)
    """
    k = 1.0 / jnp.sqrt(jnp.float32(hidden_size))
    wih_list, whh_list, bih_list, bhh_list = [], [], [], []
    for _ in range(num_grucell):
        key, k1, k2, k3, k4 = jax.random.split(key, 5)
        w_ih = jax.random.uniform(k1, (3 * hidden_size, input_size), jnp.float32, -k, k)
        w_hh = jax.random.uniform(k2, (3 * hidden_size, hidden_size), jnp.float32, -k, k)
        b_ih = jax.random.uniform(k3, (3 * hidden_size,), jnp.float32, -k, k)
        b_hh = jax.random.uniform(k4, (3 * hidden_size,), jnp.float32, -k, k)
        wih_list.append(w_ih.T)                               # (I, 3H)
        whh_list.append(w_hh.T)                               # (H, 3H)
        bih_list.append(b_ih.reshape(1, 3 * hidden_size))     # (1, 3H)
        bhh_list.append(b_hh.reshape(1, 3 * hidden_size))     # (1, 3H)
    return (jnp.stack(wih_list), jnp.stack(whh_list),
            jnp.stack(bih_list), jnp.stack(bhh_list))


def reference_forward(x, h0, w_ih, w_hh, b_ih, b_hh, labels, unroll_for):
    """Pure-JAX reference mirroring the PyTorch module semantics."""
    C, _, H = h0.shape
    out = x
    hs = [h0[c] for c in range(C)]
    ret = []
    for _ in range(unroll_for):
        for c in range(C):
            h = hs[c]
            gi = out @ w_ih[c] + b_ih[c]      # (B, 3H)
            gh = h @ w_hh[c] + b_hh[c]        # (B, 3H)
            r = jax.nn.sigmoid(gi[:, :H] + gh[:, :H])
            z = jax.nn.sigmoid(gi[:, H:2 * H] + gh[:, H:2 * H])
            n = jnp.tanh(gi[:, 2 * H:] + r * gh[:, 2 * H:])
            h = (1.0 - z) * n + z * h
            hs[c] = h
            out = h
        ret.append(out)
    ret = jnp.stack(ret, axis=1)              # (B, T, H)
    loss = jnp.mean((ret - labels) ** 2)
    return ret, loss


if __name__ == "__main__":
    UNROLL_FOR = 2
    NUM_GRUCELL = 1
    INPUT_SIZE = HIDDEN_SIZE = 2
    BATCH = 3

    key = jax.random.PRNGKey(0)
    key, kx, kh, kl, kp = jax.random.split(key, 5)

    x = jax.random.normal(kx, (BATCH, INPUT_SIZE), jnp.float32)
    h0 = jax.random.normal(kh, (NUM_GRUCELL, BATCH, HIDDEN_SIZE), jnp.float32)
    labels = jax.random.normal(kl, (BATCH, UNROLL_FOR, HIDDEN_SIZE), jnp.float32)
    w_ih, w_hh, b_ih, b_hh = init_gru_params(kp, NUM_GRUCELL, INPUT_SIZE, HIDDEN_SIZE)

    ret, loss = gru_cell_stacked(x, h0, w_ih, w_hh, b_ih, b_hh, labels,
                                 unroll_for=UNROLL_FOR)
    jax.block_until_ready((ret, loss))

    ret_ref, loss_ref = reference_forward(x, h0, w_ih, w_hh, b_ih, b_hh, labels,
                                          UNROLL_FOR)
    assert ret.shape == (BATCH, UNROLL_FOR, HIDDEN_SIZE)
    assert jnp.allclose(ret, ret_ref, atol=1e-5, rtol=1e-5)
    assert jnp.allclose(loss, loss_ref, atol=1e-5, rtol=1e-5)

    print("KERNEL_OK")
</pallas_src>

<mosaic_0001>
module attributes {stable_mosaic.version = 11 : i64} {
  func.func @_gru_stacked_kernel(%arg0: memref<2x3x2xf32, #tpu.memory_space<vmem>>, %arg1: memref<1x6x6xf32, #tpu.memory_space<vmem>>, %arg2: memref<3x4xf32, #tpu.memory_space<vmem>>, %arg3: memref<3x4xf32, #tpu.memory_space<vmem>>, %arg4: memref<1xf32, #tpu.memory_space<smem>>) attributes {dimension_semantics = [], scalar_prefetch = 0 : i64, scratch_operands = 0 : i64, tpu.core_type = #tpu.core_type<tc>} {
    %c0 = arith.constant 0 : index
    %c0_0 = arith.constant 0 : index
    %c0_1 = arith.constant 0 : index
    %0 = vector.load %arg1[%c0, %c0_0, %c0_1] : memref<1x6x6xf32, #tpu.memory_space<vmem>>, vector<1x6x6xf32>
    %1 = vector.shape_cast %0 : vector<1x6x6xf32> to vector<6x6xf32>
    %2 = vector.extract_strided_slice %1 {offsets = [4, 0], sizes = [1, 6], strides = [1, 1]} : vector<6x6xf32> to vector<1x6xf32>
    %3 = vector.extract_strided_slice %1 {offsets = [5, 0], sizes = [1, 6], strides = [1, 1]} : vector<6x6xf32> to vector<1x6xf32>
    %4 = vector.extract_strided_slice %2 {offsets = [0, 0], sizes = [1, 4], strides = [1, 1]} : vector<1x6xf32> to vector<1x4xf32>
    %5 = vector.extract_strided_slice %3 {offsets = [0, 0], sizes = [1, 4], strides = [1, 1]} : vector<1x6xf32> to vector<1x4xf32>
    %6 = arith.addf %4, %5 : vector<1x4xf32>
    %7 = vector.shape_cast %6 : vector<1x4xf32> to vector<1x4xf32>
    %8 = vector.broadcast %7 : vector<1x4xf32> to vector<3x4xf32>
    %9 = vector.extract_strided_slice %2 {offsets = [0, 4], sizes = [1, 2], strides = [1, 1]} : vector<1x6xf32> to vector<1x2xf32>
    %10 = vector.shape_cast %9 : vector<1x2xf32> to vector<1x2xf32>
    %11 = vector.broadcast %10 : vector<1x2xf32> to vector<3x2xf32>
    %12 = vector.extract_strided_slice %3 {offsets = [0, 4], sizes = [1, 2], strides = [1, 1]} : vector<1x6xf32> to vector<1x2xf32>
    %13 = vector.shape_cast %12 : vector<1x2xf32> to vector<1x2xf32>
    %14 = vector.broadcast %13 : vector<1x2xf32> to vector<3x2xf32>
    %15 = vector.extract_strided_slice %1 {offsets = [0, 0], sizes = [1, 6], strides = [1, 1]} : vector<6x6xf32> to vector<1x6xf32>
    %16 = vector.shape_cast %15 : vector<1x6xf32> to vector<1x6xf32>
    %17 = vector.broadcast %16 : vector<1x6xf32> to vector<3x6xf32>
    %18 = vector.extract_strided_slice %1 {offsets = [1, 0], sizes = [1, 6], strides = [1, 1]} : vector<6x6xf32> to vector<1x6xf32>
    %19 = vector.shape_cast %18 : vector<1x6xf32> to vector<1x6xf32>
    %20 = vector.broadcast %19 : vector<1x6xf32> to vector<3x6xf32>
    %21 = vector.extract_strided_slice %1 {offsets = [2, 0], sizes = [1, 6], strides = [1, 1]} : vector<6x6xf32> to vector<1x6xf32>
    %22 = vector.shape_cast %21 : vector<1x6xf32> to vector<1x6xf32>
    %23 = vector.broadcast %22 : vector<1x6xf32> to vector<3x6xf32>
    %24 = vector.extract_strided_slice %1 {offsets = [3, 0], sizes = [1, 6], strides = [1, 1]} : vector<6x6xf32> to vector<1x6xf32>
    %25 = vector.shape_cast %24 : vector<1x6xf32> to vector<1x6xf32>
    %26 = vector.broadcast %25 : vector<1x6xf32> to vector<3x6xf32>
    %c0_2 = arith.constant 0 : index
    %c0_3 = arith.constant 0 : index
    %c0_4 = arith.constant 0 : index
    %27 = vector.load %arg0[%c0_2, %c0_3, %c0_4] : memref<2x3x2xf32, #tpu.memory_space<vmem>>, vector<1x3x2xf32>
    %28 = vector.shape_cast %27 : vector<1x3x2xf32> to vector<3x2xf32>
    %c1 = arith.constant 1 : index
    %c0_5 = arith.constant 0 : index
    %c0_6 = arith.constant 0 : index
    %29 = vector.load %arg0[%c1, %c0_5, %c0_6] : memref<2x3x2xf32, #tpu.memory_space<vmem>>, vector<1x3x2xf32>
    %30 = vector.shape_cast %29 : vector<1x3x2xf32> to vector<3x2xf32>
    %31 = vector.extract_strided_slice %28 {offsets = [0, 0], sizes = [3, 1], strides = [1, 1]} : vector<3x2xf32> to vector<3x1xf32>
    %32 = vector.broadcast %31 : vector<3x1xf32> to vector<3x6xf32>
    %33 = arith.mulf %32, %17 : vector<3x6xf32>
    %34 = vector.extract_strided_slice %28 {offsets = [0, 1], sizes = [3, 1], strides = [1, 1]} : vector<3x2xf32> to vector<3x1xf32>
    %35 = vector.broadcast %34 : vector<3x1xf32> to vector<3x6xf32>
    %36 = arith.mulf %35, %20 : vector<3x6xf32>
    %37 = arith.addf %33, %36 : vector<3x6xf32>
    %38 = vector.extract_strided_slice %30 {offsets = [0, 0], sizes = [3, 1], strides = [1, 1]} : vector<3x2xf32> to vector<3x1xf32>
    %39 = vector.broadcast %38 : vector<3x1xf32> to vector<3x6xf32>
    %40 = arith.mulf %39, %23 : vector<3x6xf32>
    %41 = vector.extract_strided_slice %30 {offsets = [0, 1], sizes = [3, 1], strides = [1, 1]} : vector<3x2xf32> to vector<3x1xf32>
    %42 = vector.broadcast %41 : vector<3x1xf32> to vector<3x6xf32>
    %43 = arith.mulf %42, %26 : vector<3x6xf32>
    %44 = arith.addf %40, %43 : vector<3x6xf32>
    %45 = vector.extract_strided_slice %37 {offsets = [0, 0], sizes = [3, 4], strides = [1, 1]} : vector<3x6xf32> to vector<3x4xf32>
    %46 = vector.extract_strided_slice %44 {offsets = [0, 0], sizes = [3, 4], strides = [1, 1]} : vector<3x6xf32> to vector<3x4xf32>
    %47 = arith.addf %45, %46 : vector<3x4xf32>
    %48 = arith.addf %47, %8 : vector<3x4xf32>
    %49 = arith.negf %48 : vector<3x4xf32>
    %50 = math.exp %49 : vector<3x4xf32>
    %cst = arith.constant 1.000000e+00 : f32
    %51 = vector.broadcast %cst : f32 to vector<3x4xf32>
    %52 = arith.addf %51, %50 : vector<3x4xf32>
    %53 = arith.divf %51, %52 : vector<3x4xf32>
    %54 = vector.extract_strided_slice %53 {offsets = [0, 0], sizes = [3, 2], strides = [1, 1]} : vector<3x4xf32> to vector<3x2xf32>
    %55 = vector.extract_strided_slice %53 {offsets = [0, 2], sizes = [3, 2], strides = [1, 1]} : vector<3x4xf32> to vector<3x2xf32>
    %56 = vector.extract_strided_slice %37 {offsets = [0, 4], sizes = [3, 2], strides = [1, 1]} : vector<3x6xf32> to vector<3x2xf32>
    %57 = arith.addf %56, %11 : vector<3x2xf32>
    %58 = vector.extract_strided_slice %44 {offsets = [0, 4], sizes = [3, 2], strides = [1, 1]} : vector<3x6xf32> to vector<3x2xf32>
    %59 = arith.addf %58, %14 : vector<3x2xf32>
    %60 = arith.mulf %54, %59 : vector<3x2xf32>
    %61 = arith.addf %57, %60 : vector<3x2xf32>
    %62 = math.tanh %61 : vector<3x2xf32>
    %cst_7 = arith.constant 1.000000e+00 : f32
    %63 = vector.broadcast %cst_7 : f32 to vector<3x2xf32>
    %64 = arith.subf %63, %55 : vector<3x2xf32>
    %65 = arith.mulf %64, %62 : vector<3x2xf32>
    %66 = arith.mulf %55, %30 : vector<3x2xf32>
    %67 = arith.addf %65, %66 : vector<3x2xf32>
    %68 = vector.extract_strided_slice %67 {offsets = [0, 0], sizes = [3, 1], strides = [1, 1]} : vector<3x2xf32> to vector<3x1xf32>
    %69 = vector.broadcast %68 : vector<3x1xf32> to vector<3x6xf32>
    %70 = arith.mulf %69, %17 : vector<3x6xf32>
    %71 = vector.extract_strided_slice %67 {offsets = [0, 1], sizes = [3, 1], strides = [1, 1]} : vector<3x2xf32> to vector<3x1xf32>
    %72 = vector.broadcast %71 : vector<3x1xf32> to vector<3x6xf32>
    %73 = arith.mulf %72, %20 : vector<3x6xf32>
    %74 = arith.addf %70, %73 : vector<3x6xf32>
    %75 = vector.extract_strided_slice %67 {offsets = [0, 0], sizes = [3, 1], strides = [1, 1]} : vector<3x2xf32> to vector<3x1xf32>
    %76 = vector.broadcast %75 : vector<3x1xf32> to vector<3x6xf32>
    %77 = arith.mulf %76, %23 : vector<3x6xf32>
    %78 = vector.extract_strided_slice %67 {offsets = [0, 1], sizes = [3, 1], strides = [1, 1]} : vector<3x2xf32> to vector<3x1xf32>
    %79 = vector.broadcast %78 : vector<3x1xf32> to vector<3x6xf32>
    %80 = arith.mulf %79, %26 : vector<3x6xf32>
    %81 = arith.addf %77, %80 : vector<3x6xf32>
    %82 = vector.extract_strided_slice %74 {offsets = [0, 0], sizes = [3, 4], strides = [1, 1]} : vector<3x6xf32> to vector<3x4xf32>
    %83 = vector.extract_strided_slice %81 {offsets = [0, 0], sizes = [3, 4], strides = [1, 1]} : vector<3x6xf32> to vector<3x4xf32>
    %84 = arith.addf %82, %83 : vector<3x4xf32>
    %85 = arith.addf %84, %8 : vector<3x4xf32>
    %86 = arith.negf %85 : vector<3x4xf32>
    %87 = math.exp %86 : vector<3x4xf32>
    %cst_8 = arith.constant 1.000000e+00 : f32
    %88 = vector.broadcast %cst_8 : f32 to vector<3x4xf32>
    %89 = arith.addf %88, %87 : vector<3x4xf32>
    %90 = arith.divf %88, %89 : vector<3x4xf32>
    %91 = vector.extract_strided_slice %90 {offsets = [0, 0], sizes = [3, 2], strides = [1, 1]} : vector<3x4xf32> to vector<3x2xf32>
    %92 = vector.extract_strided_slice %90 {offsets = [0, 2], sizes = [3, 2], strides = [1, 1]} : vector<3x4xf32> to vector<3x2xf32>
    %93 = vector.extract_strided_slice %74 {offsets = [0, 4], sizes = [3, 2], strides = [1, 1]} : vector<3x6xf32> to vector<3x2xf32>
    %94 = arith.addf %93, %11 : vector<3x2xf32>
    %95 = vector.extract_strided_slice %81 {offsets = [0, 4], sizes = [3, 2], strides = [1, 1]} : vector<3x6xf32> to vector<3x2xf32>
    %96 = arith.addf %95, %14 : vector<3x2xf32>
    %97 = arith.mulf %91, %96 : vector<3x2xf32>
    %98 = arith.addf %94, %97 : vector<3x2xf32>
    %99 = math.tanh %98 : vector<3x2xf32>
    %cst_9 = arith.constant 1.000000e+00 : f32
    %100 = vector.broadcast %cst_9 : f32 to vector<3x2xf32>
    %101 = arith.subf %100, %92 : vector<3x2xf32>
    %102 = arith.mulf %101, %99 : vector<3x2xf32>
    %103 = arith.mulf %92, %67 : vector<3x2xf32>
    %104 = arith.addf %102, %103 : vector<3x2xf32>
    %105 = tpu.concatenate %67, %104 in 1 : vector<3x2xf32>, vector<3x2xf32> -> vector<3x4xf32>
    %c0_10 = arith.constant 0 : index
    %c0_11 = arith.constant 0 : index
    %106 = vector.load %arg3[%c0_10, %c0_11] : memref<3x4xf32, #tpu.memory_space<vmem>>, vector<3x4xf32>
    tpu.vector_store %arg3[%c0_10, %c0_11], %105 {strides = array<i32>} : memref<3x4xf32, #tpu.memory_space<vmem>>, vector<3x4xf32>,
    %c0_12 = arith.constant 0 : index
    %c0_13 = arith.constant 0 : index
    %107 = vector.load %arg2[%c0_12, %c0_13] : memref<3x4xf32, #tpu.memory_space<vmem>>, vector<3x4xf32>
    %108 = arith.subf %105, %107 : vector<3x4xf32>
    %109 = arith.mulf %108, %108 : vector<3x4xf32>
    %110 = vector.shape_cast %109 : vector<3x4xf32> to vector<1x3x4xf32>
    %cst_14 = arith.constant dense<0.000000e+00> : vector<1xf32>
    %111 = vector.multi_reduction <add>, %110, %cst_14 [1, 2] : vector<1x3x4xf32> to vector<1xf32>
    %112 = vector.shape_cast %111 : vector<1xf32> to vector<1x1x1xf32>
    %113 = vector.extract %112[0, 0, 0] : f32 from vector<1x1x1xf32>
    %cst_15 = arith.constant 1.200000e+01 : f32
    %114 = arith.divf %113, %cst_15 : f32
    %c0_16 = arith.constant 0 : index
    %115 = memref.load %arg4[%c0_16] : memref<1xf32, #tpu.memory_space<smem>>
    memref.store %114, %arg4[%c0_16] : memref<1xf32, #tpu.memory_space<smem>>
    return
  }
}

</mosaic_0001>

<bundles_post_ra>
// kernel: gru_cell_stacked.1
= control target key start
LH: loop header
LB: loop body
LE: loop exit
PB: predicated region body
PF: predicated region fallthrough
CT: control target
= control target key end

     0   :  { %v260_v2 = vmov 0   ;;  %s353_s0 = inlined_call_operand.vmem [shape: f32[2,3,2], index: 0, kind: input, shape index: {}]   ;;  %s354_s1 = inlined_call_operand.vmem [shape: f32[1,6,6], index: 1, kind: input, shape index: {}]   ;;  %s355_s2 = inlined_call_operand.vmem [shape: f32[3,4], index: 2, kind: input, shape index: {}]   ;;  %s356_s3 = inlined_call_operand.vmem [shape: f32[3,4], index: 3, kind: output, shape index: {0}]   ;;  %s357_s4 = inlined_call_operand.hbm [shape: f32[1], index: 4, kind: output, shape index: {1}]  }
   0x1   :  { %v208_v0 = vld [vmem:[%s353_s0 + $0x4] sm:$0x7]  ;;  %v29_v1 = vld [vmem:[%s353_s0] sm:$0x7]  ;;  %227 = vset.pattern.permute.xlu1 %v260_v2  ;;  %225 = vset.pattern.permute.xlu0 %v260_v2 }
   0x2   :  { %10 = vsyncpa [#allocation3], 0  ;;  %46 = vperm.xlu0 %225, %v208_v0   ;;  %34 = vperm.xlu1 %227, %v29_v1   ;;  %v261_v3 = vmov 1   ;;  %v304_v5 = vld [vmem:[%s354_s1] sm:$0x3f]  ;;  %s262_s0 = smov 124  }
   0x3   :  { %v27_v6 = vperm.slane %v304_v5, 2  ;;  %v28_v7 = vperm.slane %v304_v5, 3  ;;  %v24_v11 = vperm.slane %v304_v5, 5  ;;  %v25_v15 = vperm.slane %v304_v5, 0  ;;  %s263_s1 = smov 4   ;;  %s264_s21 = smov 2  }
   0x4   :  { %v26_v16 = vperm.slane %v304_v5, 1  ;;  %v19_v19 = vrot.slane %v304_v5, 1  ;;  %v23_v41 = vperm.slane %v304_v5, 4  ;;  %s265_s22 = smov 126   ;;  %v266_v46 = vmov 2   ;;  %s196_s27 = sshll.u32 %s357_s4, 4  ;;  %s197_s27 = int_to_ptr.hbm [resolvable:$true] %s196_s27 }
   0x5   :  { %v267_v47 = vmov 3   ;;  %vm161_vm8 = vcmask 15360   ;;  %vm163_vm9 = vcmask 26624   ;;  %s269_s5 = smov [#allocation2]  }
   0x6   :  { %v324_v21 = vadd.f32 %v19_v19, %v304_v5 }
   0x8   :  { %v22_v23 = vperm.slane %v324_v21, 4 }
   0xa   :  { %226 = vset.pattern.permute.xlu0 %v261_v3  ;;  %228 = vset.pattern.permute.xlu1 %v261_v3 }
   0xb   :  { %51 = vperm.xlu0 %226, %v208_v0   ;;  %39 = vperm.xlu1 %228, %v29_v1  }
  0x13   :  { %229 = vset.pattern.permute.xlu0 %v266_v46  ;;  %230 = vset.pattern.permute.xlu1 %v267_v47 }
  0x74   :  { %v47_v4 = vpop.permute.xlu0 %46  ;;  %v35_v14 = vpop.permute.xlu1 %34 }
  0x75   :  { %v49_v9 = vmul.f32 %v47_v4, %v27_v6  ;;  %v37_v18 = vmul.f32 %v35_v14, %v25_v15 }
  0x7d   :  { %v52_v8 = vpop.permute.xlu0 %51  ;;  %v40_v17 = vpop.permute.xlu1 %39 }
  0x7e   :  { %v54_v10 = vmul.f32 %v52_v8, %v28_v7  ;;  %v42_v20 = vmul.f32 %v40_v17, %v26_v16 }
  0x80   :  { %v55_v12 = vadd.f32 %v54_v10, %v49_v9  ;;  %v43_v22 = vadd.f32 %v42_v20, %v37_v18 }
  0x82   :  { %v78_v13 = vadd.f32 %v55_v12, %v24_v11  ;;  %v56_v24 = vadd.f32 %v55_v12, %v43_v22  ;;  %v77_v42 = vadd.f32 %v43_v22, %v23_v41 }
  0x84   :  { %80 = vrot.lane.b32.xlu2 %v78_v13, %s262_s0  ;;  %v57_v25 = vadd.f32 %v56_v24, %v22_v23 }
  0x86   :  { %v209_v26 = vmul.f32 -1.442695, %v57_v25  ;;  %v165_v25 = vld [vmem:[%s355_s2] sm:$0x7] }
  0x88   :  { %232 = vpow2.f32 %v209_v26 }
  0x8e   :  { %v233_v27 = vpop.eup %232 }
  0x8f   :  { %v61_v28 = vadd.f32 1.0, %v233_v27 }
  0x91   :  { %234 = vrcp.f32 %v61_v28  ;;  %v73_v34 = vand.u32 2147483648, %v61_v28  ;;  %vm67_vm1 = vweird.f32 %v61_v28  ;;  %v71_v35 = vand.u32 2147483647, %v61_v28 }
  0x93   :  { %v74_v37 = vor.u32 1.1754944e-38, %v73_v34  ;;  %vm72_vm3 = vcmp.eq.f32.partialorder %v71_v35, 8.507059e+37 }
  0x97   :  { %v235_v29 = vpop.eup %234 }
  0x98   :  { %v63_v30 = vmul.f32 %v235_v29, %v61_v28  ;;  %vm68_vm0 = vweird.f32 %v235_v29 }
  0x99   :  { %vm69_vm2 = vmor %vm67_vm1, %vm68_vm0 }
  0x9a   :  { %v64_v31 = vsub.f32 1.0, %v63_v30 }
  0x9c   :  { %v65_v32 = vmul.f32 %v235_v29, %v64_v31  ;;  %v268_v31 = vmov 12.0  }
  0x9e   :  { %v66_v33 = vadd.f32 %v235_v29, %v65_v32 }
  0xa0   :  { %v70_v36 = vsel %vm69_vm2, %v235_v29, %v66_v33 }
  0xa1   :  { %v75_v39 = vsel %vm72_vm3, %v74_v37, %v70_v36 }
  0xa2   :  { %v90_v49 = vsub.f32 1.0, %v75_v39 }
  0xde   :  { %v81_v38 = vpop.permute.xlu2 %80 }
  0xdf   :  { %v83_v40 = vmul.f32 %v81_v38, %v75_v39 }
  0xe1   :  { %85 = vrot.lane.b32.xlu2 %v83_v40, %s263_s1 }
  0xe9   :  { %96 = vrot.lane.b32.xlu2 %v208_v0, %s264_s21 }
 0x13b   :  { %v86_v43 = vpop.permute.xlu2 %85 }
 0x13c   :  { %v88_v44 = vadd.f32 %v86_v43, %v77_v42 }
 0x13e   :  { %236 = vtanh.f32 %v88_v44 }
 0x143   :  { %v97_v48 = vpop.permute.xlu2 %96 }
 0x144   :  { %v237_v45 = vpop.eup %236  ;;  %v99_v51 = vmul.f32 %v97_v48, %v75_v39 }
 0x145   :  { %92 = vrot.lane.b32.xlu1 %v237_v45, %s265_s22 }
 0x1b7   :  { %v93_v50 = vpop.permute.xlu1 %92 }
 0x1b8   :  { %v95_v52 = vmul.f32 %v93_v50, %v90_v49 }
 0x1ba   :  { %v100_v53 = vadd.f32 %v99_v51, %v95_v52 }
 0x1bc   :  { %108 = vperm.xlu1 %230, %v100_v53   ;;  %103 = vperm.xlu0 %229, %v100_v53  }
 0x1c4   :  { %158 = vrot.lane.b32.xlu0 %v100_v53, %s265_s22 }
 0x1c5   :  { %231 = vset.pattern.permute.xlu0 %v267_v47 }
 0x22e   :  { %v109_v54 = vpop.permute.xlu1 %108  ;;  %v104_v55 = vpop.permute.xlu0 %103 }
 0x22f   :  { %v114_v56 = vmul.f32 %v109_v54, %v28_v7  ;;  %v113_v57 = vmul.f32 %v104_v55, %v27_v6  ;;  %v111_v60 = vmul.f32 %v109_v54, %v26_v16  ;;  %v106_v61 = vmul.f32 %v104_v55, %v25_v15 }
 0x231   :  { %v115_v58 = vadd.f32 %v114_v56, %v113_v57  ;;  %v112_v62 = vadd.f32 %v111_v60, %v106_v61 }
 0x233   :  { %v138_v59 = vadd.f32 %v115_v58, %v24_v11  ;;  %v116_v63 = vadd.f32 %v115_v58, %v112_v62  ;;  %v137_v16 = vadd.f32 %v112_v62, %v23_v41 }
 0x235   :  { %140 = vrot.lane.b32.xlu2 %v138_v59, %s262_s0  ;;  %v117_v0 = vadd.f32 %v116_v63, %v22_v23 }
 0x236   :  { %v159_v26 = vpop.permute.xlu0 %158 }
 0x237   :  { %v210_v1 = vmul.f32 -1.442695, %v117_v0 }
 0x239   :  { %238 = vpow2.f32 %v210_v1 }
 0x23f   :  { %v239_v2 = vpop.eup %238 }
 0x240   :  { %v121_v3 = vadd.f32 1.0, %v239_v2 }
 0x242   :  { %240 = vrcp.f32 %v121_v3  ;;  %v133_v10 = vand.u32 2147483648, %v121_v3  ;;  %vm127_vm5 = vweird.f32 %v121_v3  ;;  %v131_v11 = vand.u32 2147483647, %v121_v3 }
 0x244   :  { %v134_v12 = vor.u32 1.1754944e-38, %v133_v10  ;;  %vm132_vm7 = vcmp.eq.f32.partialorder %v131_v11, 8.507059e+37 }
 0x248   :  { %v241_v4 = vpop.eup %240 }
 0x249   :  { %v123_v6 = vmul.f32 %v241_v4, %v121_v3  ;;  %vm128_vm4 = vweird.f32 %v241_v4 }
 0x24a   :  { %vm129_vm6 = vmor %vm127_vm5, %vm128_vm4 }
 0x24b   :  { %v124_v7 = vsub.f32 1.0, %v123_v6 }
 0x24d   :  { %v125_v8 = vmul.f32 %v241_v4, %v124_v7 }
 0x24f   :  { %v126_v9 = vadd.f32 %v241_v4, %v125_v8 }
 0x251   :  { %v130_v5 = vsel %vm129_vm6, %v241_v4, %v126_v9 }
 0x252   :  { %v135_v14 = vsel %vm132_vm7, %v134_v12, %v130_v5 }
 0x253   :  { %v150_v20 = vsub.f32 1.0, %v135_v14  ;;  %v156_v22 = vmul.f32 %v135_v14, %v100_v53 }
 0x28f   :  { %v141_v13 = vpop.permute.xlu2 %140 }
 0x290   :  { %v143_v15 = vmul.f32 %v141_v13, %v135_v14 }
 0x292   :  { %145 = vrot.lane.b32.xlu1 %v143_v15, %s263_s1 }
 0x304   :  { %v146_v17 = vpop.permute.xlu1 %145 }
 0x305   :  { %v148_v18 = vadd.f32 %v146_v17, %v137_v16 }
 0x307   :  { %242 = vtanh.f32 %v148_v18 }
 0x308   :  { %244 = vrcp.f32 %v268_v31 }
 0x30d   :  { %v243_v19 = vpop.eup %242 }
 0x30e   :  { %152 = vrot.lane.b32.xlu2 %v243_v19, %s265_s22  ;;  %v245_v32 = vpop.eup %244 }
 0x30f   :  { %v179_v33 = vmul.f32 12.0, %v245_v32  ;;  %vm183_vm10 = vweird.f32 %v245_v32 }
 0x311   :  { %v180_v34 = vsub.f32 1.0, %v179_v33 }
 0x313   :  { %v181_v38 = vmul.f32 %v245_v32, %v180_v34 }
 0x315   :  { %v182_v41 = vadd.f32 %v245_v32, %v181_v38 }
 0x317   :  { %v184_v44 = vsel %vm183_vm10, %v245_v32, %v182_v41 }
 0x368   :  { %v153_v21 = vpop.permute.xlu2 %152 }
 0x369   :  { %v155_v23 = vmul.f32 %v153_v21, %v150_v20 }
 0x36b   :  { %v157_v24 = vadd.f32 %v156_v22, %v155_v23 }
 0x36d   :  { %v162_v27 = vsel %vm161_vm8, %v159_v26, %v157_v24 }
 0x36e   :  { %v166_v28 = vsub.f32 %v162_v27, %v165_v25  ;;  %164 = vst.msk [vmem:[%s356_s3] sm:$0x7] %vm163_vm9, %v162_v27 }
 0x370   :  { %v167_v29 = vmul.f32 %v166_v28, %v166_v28 }
 0x372   :  { %v168_v30 = vsel %vm163_vm9, %v167_v29, 0.0 }
 0x373   :  { %169 = vadd.xlane.f32.xlu1 %v168_v30 }
 0x3e6   :  { %v170_v35 = vpop.xlane.xlu1 %169 }
 0x3e7   :  { %v171_v36 = vrot.slane %v170_v35, 4 }
 0x3e9   :  { %v172_v37 = vadd.f32 %v171_v36, %v170_v35 }
 0x3eb   :  { %v173_v39 = vrot.slane %v172_v37, 2 }
 0x3ed   :  { %v174_v40 = vadd.f32 %v173_v39, %v172_v37 }
 0x3ef   :  { %v175_v42 = vrot.slane %v174_v40, 1 }
 0x3f1   :  { %v176_v43 = vadd.f32 %v175_v42, %v174_v40 }
 0x3f3   :  { %211 = vpush %v176_v43 }
 0x3f4   :  { %213 = vpush %v184_v44 }
 0x424   :  { %s212_s28 = spop %211 }
 0x425   :  { %s214_s29 = spop %213 }
 0x426   :  { %s186_s30 = smul.f32 %s214_s29, %s212_s28 }
 0x428   :  { %188 = sst [smem:[#allocation2]] %s186_s30 }
 0x429   :  { %199 = dma.smem_to_hbm %s269_s5, 16, %s197_s27, [#allocation3]  }
 0x42a   :  { %258 = dma.done.wait [#allocation3], 16  }
 0x42b   :  { %259 = vsyncadd [#allocation3], 4294967280 }
 0x42c   :  { %206 = sfence }
 0x42d   :  { %207 = vsyncpa [#allocation3], 1 }

</bundles_post_ra>
